<compile_context>
chip_gen: v6e
topology: v6e:2x2x1
jax: 0.10.0
libtpu: 0.0.40
codegen_flags: <defaults>
</compile_context>

<pallas_src>
import jax
import jax.numpy as jnp
from jax import lax
from jax.experimental import pallas as pl
from jax.experimental.pallas import tpu as pltpu

IGNORE_INDEX = -100


def gcn_loss_kernel(logits_ref, labels_ref, out_ref,
                    loss_acc, valid_acc, correct_acc):
    """One tile of rows. Accumulates per-row partials; finalizes at last step."""
    i = pl.program_id(1)          # reduction axis (row tiles within this core split)

    @pl.when(i == 0)
    def _():
        loss_acc[...] = jnp.zeros_like(loss_acc)
        valid_acc[...] = jnp.zeros_like(valid_acc)
        correct_acc[...] = jnp.zeros_like(correct_acc)

    logits = logits_ref[...].astype(jnp.float32)    # (TN, C) upcast in VMEM
    labels = labels_ref[...]                        # (TN, 1) int32
    TN, C = logits.shape

    # --- cross entropy with ignore_index ---
    row_max = jnp.max(logits, axis=-1, keepdims=True)                  # (TN, 1)
    shifted = logits - row_max
    lse = jnp.log(jnp.sum(jnp.exp(shifted), axis=-1, keepdims=True)) + row_max

    col_ids = lax.broadcasted_iota(jnp.int32, (TN, C), 1)
    onehot = col_ids == labels                                          # (TN, C)
    picked = jnp.sum(jnp.where(onehot, logits, 0.0), axis=-1, keepdims=True)

    valid = labels != IGNORE_INDEX                                      # (TN, 1)
    per_row_loss = jnp.where(valid, lse - picked, 0.0)

    # --- top-1 accuracy (first-index tie-break, like torch.topk/argmax) ---
    is_max = logits == row_max
    argmax_idx = jnp.min(jnp.where(is_max, col_ids, C), axis=-1, keepdims=True)
    correct = (argmax_idx == labels).astype(jnp.float32)

    # Deferred reduction: elementwise (VALU) accumulation per step.
    loss_acc[...] += per_row_loss
    valid_acc[...] += valid.astype(jnp.float32)
    correct_acc[...] += correct

    # Finalize once: cross-sublane sums + single lane-dense (8,128) output block.
    @pl.when(i == pl.num_programs(1) - 1)
    def _():
        loss_s = jnp.sum(loss_acc[...]).reshape(1, 1)
        valid_s = jnp.sum(valid_acc[...]).reshape(1, 1)
        correct_s = jnp.sum(correct_acc[...]).reshape(1, 1)
        lane = lax.broadcasted_iota(jnp.int32, out_ref.shape, 1)
        out_ref[...] = jnp.where(lane == 0, loss_s,
                                 jnp.where(lane == 1, valid_s, correct_s))


def _round_up(x, m):
    return ((x + m - 1) // m) * m


def gcn_loss(node_preds, gts, *, tile_rows=2048, num_row_splits=2):
    """node_preds: (N, C) float logits (fp32 or bf16); gts: (N,) int labels (may be -100)."""
    N, C = node_preds.shape
    orig_N = N

    # Row tile: large for throughput, but never bigger than the (32-aligned) problem,
    # and 32-aligned so fp32/bf16 sublane packing constraints are both satisfied.
    tr = _round_up(min(int(tile_rows), _round_up(N, 32)), 32)

    total_tiles = pl.cdiv(N, tr)
    # Leading "parallel" split: uses both TensorCores on v7x; serializes (harmless)
    # on single-core v5e/v6e.
    P = max(1, min(int(num_row_splits), total_tiles))
    tiles_per_split = pl.cdiv(total_tiles, P)
    padded_N = P * tiles_per_split * tr
    pad = padded_N - N

    labels2d = gts.astype(jnp.int32).reshape(N, 1)
    if pad:
        # Padded rows carry IGNORE_INDEX -> zero loss, zero valid, zero correct.
        node_preds_p = jnp.pad(node_preds, ((0, pad), (0, 0)))
        labels_p = jnp.pad(labels2d, ((0, pad), (0, 0)),
                           constant_values=IGNORE_INDEX)
    else:
        node_preds_p, labels_p = node_preds, labels2d

    def in_map(p, i):
        return (p * tiles_per_split + i, 0)

    out = pl.pallas_call(
        gcn_loss_kernel,
        out_shape=jax.ShapeDtypeStruct((P * 8, 128), jnp.float32),
        grid_spec=pltpu.PrefetchScalarGridSpec(
            num_scalar_prefetch=0,
            grid=(P, tiles_per_split),
            in_specs=[
                pl.BlockSpec((tr, C), in_map),   # native dtype; upcast inside kernel
                pl.BlockSpec((tr, 1), in_map),
            ],
            out_specs=pl.BlockSpec((8, 128), lambda p, i: (p, 0)),
            scratch_shapes=[
                pltpu.VMEM((tr, 1), jnp.float32),   # per-row loss accumulator
                pltpu.VMEM((tr, 1), jnp.float32),   # per-row valid accumulator
                pltpu.VMEM((tr, 1), jnp.float32),   # per-row correct accumulator
            ],
        ),
        compiler_params=pltpu.CompilerParams(
            dimension_semantics=("parallel", "arbitrary")),
    )(node_preds_p, labels_p)

    # lane 0 = loss sum, lane 1 = valid count, lane 2 = correct count (per split).
    parts = jnp.sum(out.reshape(P, 8, 128)[:, 0, :3], axis=0)
    loss_sum, valid_cnt, correct_cnt = parts[0], parts[1], parts[2]

    # Note: if every label is IGNORE_INDEX this is 0/0 = nan, matching torch.
    loss_node = loss_sum / valid_cnt
    acc_node = correct_cnt * (100.0 / orig_N)     # mmcv accuracy (percent, all rows)
    return dict(loss_node=loss_node, acc_node=acc_node)

    # TODO(synk): `_ohem` (used_ohem=True) relies on host-side numpy sorting of
    # negative scores; not implemented (default path used_ohem=False is covered).


def _reference(node_preds, gts):
    logp = jax.nn.log_softmax(node_preds.astype(jnp.float32), axis=-1)
    valid = gts != IGNORE_INDEX
    safe_lbl = jnp.where(valid, gts, 0)
    nll = -jnp.take_along_axis(logp, safe_lbl[:, None], axis=-1)[:, 0]
    ref_loss = jnp.sum(jnp.where(valid, nll, 0.0)) / jnp.sum(valid)
    ref_acc = jnp.mean(
        (jnp.argmax(node_preds, axis=-1) == gts).astype(jnp.float32)) * 100.0
    return ref_loss, ref_acc


if __name__ == "__main__":
    key = jax.random.PRNGKey(0)

    # --- small test, single tile / single split ---
    k1, k2, k3, k4 = jax.random.split(key, 4)
    N, C = 16, 26                       # 26 classes consistent with neg_class=[0, 25]
    node_preds = jax.random.normal(k1, (N, C), dtype=jnp.float32)
    gts = jax.random.randint(k2, (N,), 0, C, dtype=jnp.int32)
    gts = gts.at[3].set(IGNORE_INDEX).at[11].set(IGNORE_INDEX)

    out = gcn_loss(node_preds, gts)
    jax.block_until_ready(out)
    ref_loss, ref_acc = _reference(node_preds, gts)
    assert jnp.allclose(out["loss_node"], ref_loss, atol=1e-4, rtol=1e-4)
    assert jnp.allclose(out["acc_node"], ref_acc, atol=1e-4, rtol=1e-4)

    # --- larger test exercising padding, multiple tiles and the 2-way split ---
    N2 = 200
    node_preds2 = jax.random.normal(k3, (N2, C), dtype=jnp.float32)
    gts2 = jax.random.randint(k4, (N2,), 0, C, dtype=jnp.int32)
    gts2 = gts2.at[7].set(IGNORE_INDEX).at[55].set(IGNORE_INDEX).at[190].set(IGNORE_INDEX)

    out2 = gcn_loss(node_preds2, gts2, tile_rows=64, num_row_splits=2)
    jax.block_until_ready(out2)
    ref_loss2, ref_acc2 = _reference(node_preds2, gts2)
    assert jnp.allclose(out2["loss_node"], ref_loss2, atol=1e-4, rtol=1e-4)
    assert jnp.allclose(out2["acc_node"], ref_acc2, atol=1e-4, rtol=1e-4)

    print("KERNEL_OK")
</pallas_src>

<mosaic_0001>
module attributes {stable_mosaic.version = 11 : i64} {
  func.func @gcn_loss_kernel(%arg0: i32, %arg1: i32, %arg2: memref<32x26xf32, #tpu.memory_space<vmem>>, %arg3: memref<32x1xi32, #tpu.memory_space<vmem>>, %arg4: memref<8x128xf32, #tpu.memory_space<vmem>>, %arg5: memref<32x1xf32, #tpu.memory_space<vmem>>, %arg6: memref<32x1xf32, #tpu.memory_space<vmem>>, %arg7: memref<32x1xf32, #tpu.memory_space<vmem>>) attributes {dimension_semantics = [#tpu.dimension_semantics<parallel>, #tpu.dimension_semantics<arbitrary>], iteration_bounds = array<i64: 1, 1>, scalar_prefetch = 0 : i64, scratch_operands = 3 : i64, tpu.core_type = #tpu.core_type<tc>, window_params = [{transform_indices = @transform_0, window_bounds = array<i64: 32, 26>}, {transform_indices = @transform_1, window_bounds = array<i64: 32, 1>}, {transform_indices = @transform_2, window_bounds = array<i64: 8, 128>}]} {
    %c0_i32 = arith.constant 0 : i32
    %0 = arith.cmpi eq, %arg1, %c0_i32 : i32
    %1 = arith.extui %0 : i1 to i32
    %c0_i32_0 = arith.constant 0 : i32
    %2 = arith.cmpi ne, %1, %c0_i32_0 : i32
    scf.if %2 {
      %cst_23 = arith.constant 0.000000e+00 : f32
      %49 = vector.broadcast %cst_23 : f32 to vector<32x1xf32>
      %c0_24 = arith.constant 0 : index
      %c0_25 = arith.constant 0 : index
      %50 = vector.load %arg5[%c0_24, %c0_25] : memref<32x1xf32, #tpu.memory_space<vmem>>, vector<32x1xf32>
      tpu.vector_store %arg5[%c0_24, %c0_25], %49 {strides = array<i32>} : memref<32x1xf32, #tpu.memory_space<vmem>>, vector<32x1xf32>,
      %cst_26 = arith.constant 0.000000e+00 : f32
      %51 = vector.broadcast %cst_26 : f32 to vector<32x1xf32>
      %c0_27 = arith.constant 0 : index
      %c0_28 = arith.constant 0 : index
      %52 = vector.load %arg6[%c0_27, %c0_28] : memref<32x1xf32, #tpu.memory_space<vmem>>, vector<32x1xf32>
      tpu.vector_store %arg6[%c0_27, %c0_28], %51 {strides = array<i32>} : memref<32x1xf32, #tpu.memory_space<vmem>>, vector<32x1xf32>,
      %cst_29 = arith.constant 0.000000e+00 : f32
      %53 = vector.broadcast %cst_29 : f32 to vector<32x1xf32>
      %c0_30 = arith.constant 0 : index
      %c0_31 = arith.constant 0 : index
      %54 = vector.load %arg7[%c0_30, %c0_31] : memref<32x1xf32, #tpu.memory_space<vmem>>, vector<32x1xf32>
      tpu.vector_store %arg7[%c0_30, %c0_31], %53 {strides = array<i32>} : memref<32x1xf32, #tpu.memory_space<vmem>>, vector<32x1xf32>,
    } else {
    }
    %c0 = arith.constant 0 : index
    %c0_1 = arith.constant 0 : index
    %3 = vector.load %arg2[%c0, %c0_1] : memref<32x26xf32, #tpu.memory_space<vmem>>, vector<32x26xf32>
    %c0_2 = arith.constant 0 : index
    %c0_3 = arith.constant 0 : index
    %4 = vector.load %arg3[%c0_2, %c0_3] : memref<32x1xi32, #tpu.memory_space<vmem>>, vector<32x1xi32>
    %cst = arith.constant dense<0xFF800000> : vector<32xf32>
    %5 = vector.multi_reduction <maximumf>, %3, %cst [1] : vector<32x26xf32> to vector<32xf32>
    %6 = vector.shape_cast %5 : vector<32xf32> to vector<32x1xf32>
    %7 = vector.broadcast %6 : vector<32x1xf32> to vector<32x26xf32>
    %8 = arith.subf %3, %7 : vector<32x26xf32>
    %9 = math.exp %8 : vector<32x26xf32>
    %cst_4 = arith.constant dense<0.000000e+00> : vector<32xf32>
    %10 = vector.multi_reduction <add>, %9, %cst_4 [1] : vector<32x26xf32> to vector<32xf32>
    %11 = vector.shape_cast %10 : vector<32xf32> to vector<32x1xf32>
    %12 = math.log %11 : vector<32x1xf32>
    %13 = arith.addf %12, %6 : vector<32x1xf32>
    %14 = tpu.iota {dimensions = array<i32: 1>} : vector<32x26xi32>
    %15 = vector.broadcast %4 : vector<32x1xi32> to vector<32x26xi32>
    %16 = arith.cmpi eq, %14, %15 : vector<32x26xi32>
    %cst_5 = arith.constant 0.000000e+00 : f32
    %17 = vector.broadcast %cst_5 : f32 to vector<32x26xf32>
    %18 = arith.select %16, %3, %17 : vector<32x26xi1>, vector<32x26xf32>
    %cst_6 = arith.constant dense<0.000000e+00> : vector<32xf32>
    %19 = vector.multi_reduction <add>, %18, %cst_6 [1] : vector<32x26xf32> to vector<32xf32>
    %20 = vector.shape_cast %19 : vector<32xf32> to vector<32x1xf32>
    %c-100_i32 = arith.constant -100 : i32
    %21 = vector.broadcast %c-100_i32 : i32 to vector<32x1xi32>
    %22 = arith.cmpi ne, %4, %21 : vector<32x1xi32>
    %23 = arith.subf %13, %20 : vector<32x1xf32>
    %cst_7 = arith.constant 0.000000e+00 : f32
    %24 = vector.broadcast %cst_7 : f32 to vector<32x1xf32>
    %25 = arith.select %22, %23, %24 : vector<32x1xi1>, vector<32x1xf32>
    %26 = vector.broadcast %6 : vector<32x1xf32> to vector<32x26xf32>
    %27 = arith.cmpf oeq, %3, %26 : vector<32x26xf32>
    %c26_i32 = arith.constant 26 : i32
    %28 = vector.broadcast %c26_i32 : i32 to vector<32x26xi32>
    %29 = arith.select %27, %14, %28 : vector<32x26xi1>, vector<32x26xi32>
    %cst_8 = arith.constant dense<2147483647> : vector<32xi32>
    %30 = vector.multi_reduction <minsi>, %29, %cst_8 [1] : vector<32x26xi32> to vector<32xi32>
    %31 = vector.shape_cast %30 : vector<32xi32> to vector<32x1xi32>
    %32 = arith.cmpi eq, %31, %4 : vector<32x1xi32>
    %33 = arith.extui %32 : vector<32x1xi1> to vector<32x1xi32>
    %34 = arith.sitofp %33 : vector<32x1xi32> to vector<32x1xf32>
    %c0_9 = arith.constant 0 : index
    %c0_10 = arith.constant 0 : index
    %35 = vector.load %arg5[%c0_9, %c0_10] : memref<32x1xf32, #tpu.memory_space<vmem>>, vector<32x1xf32>
    %36 = arith.addf %35, %25 : vector<32x1xf32>
    %c0_11 = arith.constant 0 : index
    %c0_12 = arith.constant 0 : index
    %37 = vector.load %arg5[%c0_11, %c0_12] : memref<32x1xf32, #tpu.memory_space<vmem>>, vector<32x1xf32>
    tpu.vector_store %arg5[%c0_11, %c0_12], %36 {strides = array<i32>} : memref<32x1xf32, #tpu.memory_space<vmem>>, vector<32x1xf32>,
    %c0_13 = arith.constant 0 : index
    %c0_14 = arith.constant 0 : index
    %38 = vector.load %arg6[%c0_13, %c0_14] : memref<32x1xf32, #tpu.memory_space<vmem>>, vector<32x1xf32>
    %39 = arith.extui %22 : vector<32x1xi1> to vector<32x1xi32>
    %40 = arith.sitofp %39 : vector<32x1xi32> to vector<32x1xf32>
    %41 = arith.addf %38, %40 : vector<32x1xf32>
    %c0_15 = arith.constant 0 : index
    %c0_16 = arith.constant 0 : index
    %42 = vector.load %arg6[%c0_15, %c0_16] : memref<32x1xf32, #tpu.memory_space<vmem>>, vector<32x1xf32>
    tpu.vector_store %arg6[%c0_15, %c0_16], %41 {strides = array<i32>} : memref<32x1xf32, #tpu.memory_space<vmem>>, vector<32x1xf32>,
    %c0_17 = arith.constant 0 : index
    %c0_18 = arith.constant 0 : index
    %43 = vector.load %arg7[%c0_17, %c0_18] : memref<32x1xf32, #tpu.memory_space<vmem>>, vector<32x1xf32>
    %44 = arith.addf %43, %34 : vector<32x1xf32>
    %c0_19 = arith.constant 0 : index
    %c0_20 = arith.constant 0 : index
    %45 = vector.load %arg7[%c0_19, %c0_20] : memref<32x1xf32, #tpu.memory_space<vmem>>, vector<32x1xf32>
    tpu.vector_store %arg7[%c0_19, %c0_20], %44 {strides = array<i32>} : memref<32x1xf32, #tpu.memory_space<vmem>>, vector<32x1xf32>,
    %c0_i32_21 = arith.constant 0 : i32
    %46 = arith.cmpi eq, %arg1, %c0_i32_21 : i32
    %47 = arith.extui %46 : i1 to i32
    %c0_i32_22 = arith.constant 0 : i32
    %48 = arith.cmpi ne, %47, %c0_i32_22 : i32
    scf.if %48 {
      %c0_23 = arith.constant 0 : index
      %c0_24 = arith.constant 0 : index
      %49 = vector.load %arg5[%c0_23, %c0_24] : memref<32x1xf32, #tpu.memory_space<vmem>>, vector<32x1xf32>
      %50 = vector.shape_cast %49 : vector<32x1xf32> to vector<1x32x1xf32>
      %cst_25 = arith.constant dense<0.000000e+00> : vector<1xf32>
      %51 = vector.multi_reduction <add>, %50, %cst_25 [1, 2] : vector<1x32x1xf32> to vector<1xf32>
      %52 = vector.shape_cast %51 : vector<1xf32> to vector<1x1x1xf32>
      %53 = vector.extract %52[0, 0, 0] : f32 from vector<1x1x1xf32>
      %54 = vector.broadcast %53 : f32 to vector<1x1xf32>
      %c0_26 = arith.constant 0 : index
      %c0_27 = arith.constant 0 : index
      %55 = vector.load %arg6[%c0_26, %c0_27] : memref<32x1xf32, #tpu.memory_space<vmem>>, vector<32x1xf32>
      %56 = vector.shape_cast %55 : vector<32x1xf32> to vector<1x32x1xf32>
      %cst_28 = arith.constant dense<0.000000e+00> : vector<1xf32>
      %57 = vector.multi_reduction <add>, %56, %cst_28 [1, 2] : vector<1x32x1xf32> to vector<1xf32>
      %58 = vector.shape_cast %57 : vector<1xf32> to vector<1x1x1xf32>
      %59 = vector.extract %58[0, 0, 0] : f32 from vector<1x1x1xf32>
      %60 = vector.broadcast %59 : f32 to vector<1x1xf32>
      %c0_29 = arith.constant 0 : index
      %c0_30 = arith.constant 0 : index
      %61 = vector.load %arg7[%c0_29, %c0_30] : memref<32x1xf32, #tpu.memory_space<vmem>>, vector<32x1xf32>
      %62 = vector.shape_cast %61 : vector<32x1xf32> to vector<1x32x1xf32>
      %cst_31 = arith.constant dense<0.000000e+00> : vector<1xf32>
      %63 = vector.multi_reduction <add>, %62, %cst_31 [1, 2] : vector<1x32x1xf32> to vector<1xf32>
      %64 = vector.shape_cast %63 : vector<1xf32> to vector<1x1x1xf32>
      %65 = vector.extract %64[0, 0, 0] : f32 from vector<1x1x1xf32>
      %66 = vector.broadcast %65 : f32 to vector<1x1xf32>
      %67 = tpu.iota {dimensions = array<i32: 1>} : vector<8x128xi32>
      %c0_i32_32 = arith.constant 0 : i32
      %68 = vector.broadcast %c0_i32_32 : i32 to vector<8x128xi32>
      %69 = arith.cmpi eq, %67, %68 : vector<8x128xi32>
      %c1_i32 = arith.constant 1 : i32
      %70 = vector.broadcast %c1_i32 : i32 to vector<8x128xi32>
      %71 = arith.cmpi eq, %67, %70 : vector<8x128xi32>
      %72 = vector.shape_cast %60 : vector<1x1xf32> to vector<1x1xf32>
      %73 = vector.broadcast %72 : vector<1x1xf32> to vector<8x128xf32>
      %74 = vector.shape_cast %66 : vector<1x1xf32> to vector<1x1xf32>
      %75 = vector.broadcast %74 : vector<1x1xf32> to vector<8x128xf32>
      %76 = arith.select %71, %73, %75 : vector<8x128xi1>, vector<8x128xf32>
      %77 = vector.shape_cast %54 : vector<1x1xf32> to vector<1x1xf32>
      %78 = vector.broadcast %77 : vector<1x1xf32> to vector<8x128xf32>
      %79 = arith.select %69, %78, %76 : vector<8x128xi1>, vector<8x128xf32>
      %c0_33 = arith.constant 0 : index
      %c0_34 = arith.constant 0 : index
      %80 = vector.load %arg4[%c0_33, %c0_34] : memref<8x128xf32, #tpu.memory_space<vmem>>, vector<8x128xf32>
      tpu.vector_store %arg4[%c0_33, %c0_34], %79 {strides = array<i32>} : memref<8x128xf32, #tpu.memory_space<vmem>>, vector<8x128xf32>,
    } else {
    }
    return
  }
  func.func @transform_0(%arg0: i32, %arg1: i32) -> (i32, i32) {
    %c1_i32 = arith.constant 1 : i32
    %0 = arith.muli %arg0, %c1_i32 : i32
    %1 = arith.addi %0, %arg1 : i32
    %c0_i32 = arith.constant 0 : i32
    %c0_i32_0 = arith.constant 0 : i32
    return %1, %c0_i32 : i32, i32
  }
  func.func @transform_1(%arg0: i32, %arg1: i32) -> (i32, i32) {
    %c1_i32 = arith.constant 1 : i32
    %0 = arith.muli %arg0, %c1_i32 : i32
    %1 = arith.addi %0, %arg1 : i32
    %c0_i32 = arith.constant 0 : i32
    %c0_i32_0 = arith.constant 0 : i32
    return %1, %c0_i32 : i32, i32
  }
  func.func @transform_2(%arg0: i32, %arg1: i32) -> (i32, i32) {
    %c0_i32 = arith.constant 0 : i32
    %c0_i32_0 = arith.constant 0 : i32
    return %arg0, %c0_i32 : i32, i32
  }
}

</mosaic_0001>

<bundles_post_ra>
// kernel: tpu_custom_call.1
= control target key start
LH: loop header
LB: loop body
LE: loop exit
PB: predicated region body
PF: predicated region fallthrough
CT: control target
= control target key end

     0   :  { %vm81_vm0 = vcmask 211968   ;;  %s708_s0 = inlined_call_operand.vmem [shape: f32[32,26], index: 0, kind: input, shape index: {}]   ;;  %s709_s1 = inlined_call_operand.vmem [shape: s32[32,1], index: 1, kind: input, shape index: {}]   ;;  %s710_s2 = inlined_call_operand.hbm [shape: f32[8,128], index: 2, kind: output, shape index: {}]  }
   0x1   :  { %v476_v0 = vld [vmem:[%s708_s0] sm:$0xff]  ;;  %v481_v1 = vld [vmem:[%s708_s0 + $0x10] sm:$0xff]  ;;  %v486_v2 = vld [vmem:[%s708_s0 + $0x8] sm:$0xff] }
   0x2   :  { %v82_v3 = vsel %vm81_vm0, %v476_v0, -inf  ;;  %v88_v4 = vsel %vm81_vm0, %v481_v1, -inf  ;;  %v495_v5 = vld [vmem:[%s708_s0 + $0x18] sm:$0xff] }
   0x3   :  { %7 = vsyncpa [#allocation6], 0  ;;  %83 = vmax.xlane.f32.xlu0 %v82_v3  ;;  %89 = vmax.xlane.f32.xlu1 %v88_v4  ;;  %v85_v6 = vsel %vm81_vm0, %v486_v2, -inf  ;;  %v91_v7 = vsel %vm81_vm0, %v495_v5, -inf  ;;  %v455_v8 = vmov 0   ;;  %v130_v9 = vlaneseq  ;;  %v539_v26 = vld [vmem:[%s709_s1 + $0x8] sm:$0xff] }
   0x4   :  { %416 = vset.pattern.permute.xlu1 %v455_v8  ;;  %415 = vset.pattern.permute.xlu0 %v455_v8  ;;  %v545_v27 = vld [vmem:[%s709_s1 + $0x10] sm:$0xff]  ;;  %v550_v28 = vld [vmem:[%s709_s1] sm:$0xff]  ;;  %v572_v38 = vld [vmem:[%s709_s1 + $0x18] sm:$0xff]  ;;  %vm60_vm10 = vcmask 7168   ;;  %vm165_vm12 = vcmp.ne.s32.totalorder %v539_v26, 4294967196  ;;  %s457_s25 = smov [#allocation5]  }
   0x5   :  { %v501_v10 = vand.u32 127, %v130_v9  ;;  %vm164_vm13 = vcmp.ne.s32.totalorder %v550_v28, 4294967196  ;;  %vm166_vm14 = vcmp.ne.s32.totalorder %v545_v27, 4294967196  ;;  %s378_s26 = sshll.u32 %s457_s25, 4  ;;  %s379_s26 = int_to_ptr.vmem [resolvable:$true] %s378_s26 }
   0x6   :  { %s433_s28 = scalar_lea.vmem %s379_s26, 128  ;;  %p438_p1 = scmp.lt.s32.totalorder %s379_s26, %s379_s26 }
   0x7   :  { %86 = vmax.xlane.f32.xlu0 %v85_v6  ;;  %92 = vmax.xlane.f32.xlu1 %v91_v7  ;;  %p434_p0 = scmp.ne.s32.totalorder %s379_s26, %s433_s28  ;;  %p439_p2 = scmp.lt.s32.totalorder %s433_s28, %s433_s28 }
   0x9   :  { %p440_p3 = por %p439_p2, %p438_p1 }
   0xb   :  { %p441_p4 = pnand %p440_p3, %p434_p0 }
  0x8c   :  { %v503_v11 = vpop.xlane.xlu0 %83  ;;  %v505_v12 = vpop.xlane.xlu1 %89 }
  0x8d   :  { %vm176_vm1 = vcmp.eq.f32.partialorder %v476_v0, %v503_v11  ;;  %vm178_vm2 = vcmp.eq.f32.partialorder %v481_v1, %v505_v12  ;;  %v94_v39 = vsub.f32 %v476_v0, %v503_v11  ;;  %v96_v41 = vsub.f32 %v481_v1, %v505_v12 }
  0x8e   :  { %v180_v13 = vsel %vm176_vm1, %v501_v10, 26  ;;  %v182_v14 = vsel %vm178_vm2, %v501_v10, 26  ;;  %vm167_vm2 = vcmp.ne.s32.totalorder %v572_v38, 4294967196 }
  0x8f   :  { %v514_v15 = vsel %vm81_vm0, %v180_v13, 2147483647  ;;  %v520_v18 = vsel %vm81_vm0, %v182_v14, 2147483647  ;;  %v98_v40 = vmul.f32 1.442695, %v94_v39 }
  0x90   :  { %v516_v16 = vpop.xlane.xlu0 %86  ;;  %v186_v17 = vshra.s32 %v514_v15, 16  ;;  %v216_v19 = vshra.s32 %v520_v18, 16  ;;  %v556_v31 = vpop.xlane.xlu1 %92  ;;  %v102_v42 = vmul.f32 1.442695, %v96_v41  ;;  %v215_v55 = vand.u32 65535, %v520_v18 }
  0x91   :  { %vm177_vm3 = vcmp.eq.f32.partialorder %v486_v2, %v516_v16  ;;  %v95_v29 = vsub.f32 %v486_v2, %v516_v16  ;;  %vm179_vm4 = vcmp.eq.f32.partialorder %v495_v5, %v556_v31  ;;  %v97_v43 = vsub.f32 %v495_v5, %v556_v31 }
  0x92   :  { %v525_v20 = vcvt.s32.f32 %v186_v17  ;;  %v181_v21 = vsel %vm177_vm3, %v501_v10, 26  ;;  %v218_v23 = vcvt.s32.f32 %v216_v19  ;;  %v183_v32 = vsel %vm179_vm4, %v501_v10, 26 }
  0x93   :  { %v529_v22 = vsel %vm81_vm0, %v181_v21, 2147483647  ;;  %v100_v30 = vmul.f32 1.442695, %v95_v29  ;;  %v562_v33 = vsel %vm81_vm0, %v183_v32, 2147483647  ;;  %v217_v60 = vcvt.s32.f32 %v215_v55 }
  0x94   :  { %189 = vmin.xlane.f32.xlu0 %v525_v20  ;;  %v201_v24 = vshra.s32 %v529_v22, 16  ;;  %v231_v35 = vshra.s32 %v562_v33, 16  ;;  %v104_v44 = vmul.f32 1.442695, %v97_v43  ;;  %v185_v61 = vand.u32 65535, %v514_v15 }
  0x95   :  { %417 = vpow2.f32 %v100_v30  ;;  %v200_v6 = vand.u32 65535, %v529_v22 }
  0x96   :  { %v533_v25 = vcvt.s32.f32 %v201_v24  ;;  %v566_v37 = vcvt.s32.f32 %v231_v35  ;;  %419 = vpow2.f32 %v98_v40  ;;  %v187_v4 = vcvt.s32.f32 %v185_v61 }
  0x97   :  { %421 = vpow2.f32 %v102_v42 }
  0x98   :  { %219 = vmin.xlane.f32.xlu0 %v218_v23  ;;  %204 = vmin.xlane.f32.xlu1 %v533_v25  ;;  %423 = vpow2.f32 %v104_v44 }
  0xa2   :  { %v418_v34 = vpop.eup %417 }
  0xa3   :  { %v109_v36 = vsel %vm81_vm0, %v418_v34, 0.0  ;;  %v420_v45 = vpop.eup %419 }
  0xa4   :  { %v106_v46 = vsel %vm81_vm0, %v420_v45, 0.0  ;;  %v422_v47 = vpop.eup %421 }
  0xa5   :  { %v112_v48 = vsel %vm81_vm0, %v422_v47, 0.0  ;;  %v424_v49 = vpop.eup %423 }
  0xa6   :  { %v115_v50 = vsel %vm81_vm0, %v424_v49, 0.0 }
  0xa9   :  { %136 = vperm.xlu1 %416, %v539_v26  }
  0xad   :  { %139 = vperm.xlu1 %416, %v545_v27  }
  0xae   :  { %133 = vperm.xlu0 %415, %v550_v28  }
  0xcd   :  { %110 = vadd.xlane.f32.xlu0 %v109_v36 }
  0xd1   :  { %234 = vmin.xlane.f32.xlu1 %v566_v37 }
  0xe2   :  { %142 = vperm.xlu1 %416, %v572_v38  }
 0x106   :  { %107 = vadd.xlane.f32.xlu1 %v106_v46 }
 0x10a   :  { %113 = vadd.xlane.f32.xlu1 %v112_v48 }
 0x10e   :  { %116 = vadd.xlane.f32.xlu1 %v115_v50 }
 0x11d   :  { %v584_v51 = vpop.xlane.xlu0 %189 }
 0x11e   :  { %vm191_vm9 = vcmp.eq.f32.partialorder %v525_v20, %v584_v51 }
 0x11f   :  { %v192_v8 = vsel %vm191_vm9, %v187_v4, inf }
 0x121   :  { %v586_v52 = vpop.xlane.xlu1 %204  ;;  %v588_v53 = vpop.xlane.xlu0 %219 }
 0x122   :  { %vm221_vm6 = vcmp.eq.f32.partialorder %v218_v23, %v588_v53  ;;  %vm206_vm11 = vcmp.eq.f32.partialorder %v533_v25, %v586_v52  ;;  %v230_v23 = vand.u32 65535, %v562_v33 }
 0x123   :  { %v222_v63 = vsel %vm221_vm6, %v217_v60, inf  ;;  %vm365_vm6 = vcmp.eq.s32.totalorder %v501_v10, 1 }
 0x124   :  { %v232_v25 = vcvt.s32.f32 %v230_v23 }
 0x125   :  { %v137_v54 = vpop.permute.xlu1 %136 }
 0x126   :  { %vm145_vm5 = vcmp.eq.s32.totalorder %v501_v10, %v137_v54 }
 0x127   :  { %v149_v56 = vsel %vm145_vm5, %v486_v2, 0.0 }
 0x128   :  { %v155_v57 = vsel %vm81_vm0, %v149_v56, 0.0 }
 0x129   :  { %v140_v58 = vpop.permute.xlu1 %139  ;;  %156 = vadd.xlane.f32.xlu0 %v155_v57  ;;  %v134_v59 = vpop.permute.xlu0 %133 }
 0x12a   :  { %vm146_vm7 = vcmp.eq.s32.totalorder %v501_v10, %v140_v58  ;;  %vm144_vm8 = vcmp.eq.s32.totalorder %v501_v10, %v134_v59 }
 0x12b   :  { %v148_v62 = vsel %vm144_vm8, %v476_v0, 0.0  ;;  %v150_v2 = vsel %vm146_vm7, %v481_v1, 0.0  ;;  %v456_v0 = vmov 0.0   ;;  %v202_v1 = vcvt.s32.f32 %v200_v6 }
 0x12c   :  { %v152_v3 = vsel %vm81_vm0, %v148_v62, 0.0  ;;  %v158_v7 = vsel %vm81_vm0, %v150_v2, 0.0  ;;  %62 = vst.msk [vmem:[#allocation2 + $0x8] sm:$0xff] %vm60_vm10, %v456_v0  ;;  %66 = vst.msk [vmem:[#allocation3 + $0x8] sm:$0xff] %vm60_vm10, %v456_v0  ;;  %v403_v14 = vsel %vm165_vm12, 1.0, %v456_v0  ;;  %v402_v18 = vsel %vm164_vm13, 1.0, %v456_v0 }
 0x12d   :  { %223 = vmin.xlane.f32.xlu0 %v222_v63  ;;  %153 = vadd.xlane.f32.xlu1 %v152_v3  ;;  %61 = vst.msk [vmem:[#allocation2] sm:$0xff] %vm60_vm10, %v456_v0  ;;  %63 = vst.msk [vmem:[#allocation2 + $0x10] sm:$0xff] %vm60_vm10, %v456_v0  ;;  %v207_v9 = vsel %vm206_vm11, %v202_v1, inf  ;;  %v404_v21 = vsel %vm166_vm14, 1.0, %v456_v0  ;;  %v405_v33 = vsel %vm167_vm2, 1.0, %v456_v0  ;;  %v226_v62 = vcvt.f32.s32 %v588_v53 }
 0x12e   :  { %64 = vst.msk [vmem:[#allocation2 + $0x18] sm:$0xff] %vm60_vm10, %v456_v0  ;;  %65 = vst.msk [vmem:[#allocation3] sm:$0xff] %vm60_vm10, %v456_v0  ;;  %vm364_vm7 = vcmp.eq.s32.totalorder %v501_v10, 0 }
 0x12f   :  { %67 = vst.msk [vmem:[#allocation3 + $0x10] sm:$0xff] %vm60_vm10, %v456_v0  ;;  %68 = vst.msk [vmem:[#allocation3 + $0x18] sm:$0xff] %vm60_vm10, %v456_v0 }
 0x130   :  { %69 = vst.msk [vmem:[#allocation4] sm:$0xff] %vm60_vm10, %v456_v0  ;;  %70 = vst.msk [vmem:[#allocation4 + $0x8] sm:$0xff] %vm60_vm10, %v456_v0 }
 0x131   :  { %159 = vadd.xlane.f32.xlu0 %v158_v7  ;;  %193 = vmin.xlane.f32.xlu1 %v192_v8  ;;  %71 = vst.msk [vmem:[#allocation4 + $0x10] sm:$0xff] %vm60_vm10, %v456_v0  ;;  %72 = vst.msk [vmem:[#allocation4 + $0x18] sm:$0xff] %vm60_vm10, %v456_v0  ;;  %v196_v7 = vcvt.f32.s32 %v584_v51 }
 0x133   :  { %v270_v13 = vld [vmem:[#allocation3 + $0x8] sm:$0xff] }
 0x134   :  { %v282_v15 = vadd.f32 %v403_v14, %v270_v13  ;;  %v257_v3 = vld [vmem:[#allocation2 + $0x8] sm:$0xff]  ;;  %v227_v13 = vshll.u32 %v226_v62, 16  ;;  %v256_v14 = vld [vmem:[#allocation2] sm:$0xff] }
 0x135   :  { %208 = vmin.xlane.f32.xlu1 %v207_v9  ;;  %v269_v17 = vld [vmem:[#allocation3] sm:$0xff] }
 0x136   :  { %286 = vst.msk [vmem:[#allocation3 + $0x8] sm:$0xff] %vm60_vm10, %v282_v15  ;;  %v281_v19 = vadd.f32 %v402_v18, %v269_v17  ;;  %v271_v20 = vld [vmem:[#allocation3 + $0x10] sm:$0xff]  ;;  %v272_v35 = vld [vmem:[#allocation3 + $0x18] sm:$0xff] }
 0x137   :  { %v283_v22 = vadd.f32 %v404_v21, %v271_v20  ;;  %v284_v36 = vadd.f32 %v405_v33, %v272_v35  ;;  %v289_v35 = vld [vmem:[#allocation4] sm:$0xff] }
 0x138   :  { %285 = vst.msk [vmem:[#allocation3] sm:$0xff] %vm60_vm10, %v281_v19  ;;  %v197_v19 = vshll.u32 %v196_v7, 16 }
 0x139   :  { %287 = vst.msk [vmem:[#allocation3 + $0x10] sm:$0xff] %vm60_vm10, %v283_v22  ;;  %288 = vst.msk [vmem:[#allocation3 + $0x18] sm:$0xff] %vm60_vm10, %v284_v36  ;;  %v211_v22 = vcvt.f32.s32 %v586_v52 }
 0x13f   :  { %v324_v39 = vld [vmem:[#allocation3] sm:$0xff] }
 0x140   :  { %v326_v40 = vld [vmem:[#allocation3 + $0x10] sm:$0xff]  ;;  %v328_v41 = vsel %vm60_vm10, %v324_v39, 0.0  ;;  %v327_v45 = vld [vmem:[#allocation3 + $0x18] sm:$0xff]  ;;  %v212_v39 = vshll.u32 %v211_v22, 16 }
 0x141   :  { %v331_v43 = vsel %vm60_vm10, %v326_v40, 0.0  ;;  %v333_v46 = vsel %vm60_vm10, %v327_v45, 0.0 }
 0x156   :  { %v111_v48 = vpop.xlane.xlu0 %110 }
 0x157   :  { %425 = vlog2.f32 %v111_v48 }
 0x15a   :  { %v647_v24 = vpop.xlane.xlu1 %234 }
 0x15b   :  { %vm236_vm15 = vcmp.eq.f32.partialorder %v566_v37, %v647_v24  ;;  %v325_v37 = vld [vmem:[#allocation3 + $0x8] sm:$0xff] }
 0x15c   :  { %v237_v29 = vsel %vm236_vm15, %v232_v25, inf }
 0x15d   :  { %238 = vmin.xlane.f32.xlu1 %v237_v29  ;;  %v258_v29 = vld [vmem:[#allocation2 + $0x10] sm:$0xff] }
 0x15e   :  { %v143_v30 = vpop.permute.xlu1 %142 }
 0x15f   :  { %vm147_vm1 = vcmp.eq.s32.totalorder %v501_v10, %v143_v30 }
 0x160   :  { %v151_v32 = vsel %vm147_vm1, %v495_v5, 0.0  ;;  %v329_v5 = vsel %vm60_vm10, %v325_v37, 0.0 }
 0x161   :  { %v161_v34 = vsel %vm81_vm0, %v151_v32, 0.0  ;;  %v330_v42 = vadd.f32 %v329_v5, %v328_v41  ;;  %v290_v5 = vld [vmem:[#allocation4 + $0x8] sm:$0xff] }
 0x162   :  { %162 = vadd.xlane.f32.xlu1 %v161_v34 }
 0x163   :  { %v332_v44 = vadd.f32 %v331_v43, %v330_v42 }
 0x164   :  { %v426_v54 = vpop.eup %425 }
 0x165   :  { %v334_v47 = vadd.f32 %v333_v46, %v332_v44  ;;  %v121_v55 = vmul.f32 0.6931472, %v426_v54 }
 0x167   :  { %335 = vadd.xlane.f32.xlu1 %v334_v47  ;;  %v127_v58 = vadd.f32 %v121_v55, %v516_v16 }
 0x18f   :  { %v108_v49 = vpop.xlane.xlu1 %107 }
 0x190   :  { %427 = vlog2.f32 %v108_v49  ;;  %v292_v49 = vld [vmem:[#allocation4 + $0x18] sm:$0xff] }
 0x193   :  { %v114_v50 = vpop.xlane.xlu1 %113 }
 0x194   :  { %429 = vlog2.f32 %v114_v50 }
 0x197   :  { %v117_v60 = vpop.xlane.xlu1 %116 }
 0x198   :  { %431 = vlog2.f32 %v117_v60 }
 0x19d   :  { %v428_v56 = vpop.eup %427 }
 0x19e   :  { %v119_v57 = vmul.f32 0.6931472, %v428_v56  ;;  %v259_v56 = vld [vmem:[#allocation2 + $0x18] sm:$0xff] }
 0x1a0   :  { %v126_v6 = vadd.f32 %v119_v57, %v503_v11  ;;  %v291_v11 = vld [vmem:[#allocation4 + $0x10] sm:$0xff] }
 0x1a1   :  { %v430_v59 = vpop.eup %429 }
 0x1a2   :  { %v123_v2 = vmul.f32 0.6931472, %v430_v59 }
 0x1a4   :  { %v128_v18 = vadd.f32 %v123_v2, %v505_v12 }
 0x1a5   :  { %v432_v43 = vpop.eup %431 }
 0x1a6   :  { %v125_v44 = vmul.f32 0.6931472, %v432_v43 }
 0x1a8   :  { %v129_v50 = vadd.f32 %v125_v44, %v556_v31 }
 0x1b2   :  { %v157_v61 = vpop.xlane.xlu0 %156 }
 0x1b3   :  { %v169_v63 = vsub.f32 %v127_v58, %v157_v61 }
 0x1b5   :  { %v173_v4 = vsel %vm165_vm12, %v169_v63, 0.0 }
 0x1b6   :  { %v261_v8 = vadd.f32 %v257_v3, %v173_v4  ;;  %v154_v1 = vpop.xlane.xlu1 %153  ;;  %v224_v9 = vpop.xlane.xlu0 %223 }
 0x1b7   :  { %v168_v16 = vsub.f32 %v126_v6, %v154_v1  ;;  %v225_v15 = vcvt.f32.s32 %v224_v9 }
 0x1b8   :  { %266 = vst.msk [vmem:[#allocation2 + $0x8] sm:$0xff] %vm60_vm10, %v261_v8 }
 0x1b9   :  { %v172_v53 = vsel %vm164_vm13, %v168_v16, 0.0  ;;  %v228_v17 = vadd.s32 %v227_v13, %v225_v15 }
 0x1ba   :  { %v260_v20 = vadd.f32 %v256_v14, %v172_v53  ;;  %v194_v21 = vpop.xlane.xlu1 %193  ;;  %v160_v51 = vpop.xlane.xlu0 %159 }
 0x1bb   :  { %vm246_vm0 = vcmp.eq.s32.totalorder %v228_v17, %v545_v27  ;;  %v195_v23 = vcvt.f32.s32 %v194_v21  ;;  %v170_v25 = vsub.f32 %v128_v18, %v160_v51 }
 0x1bc   :  { %265 = vst.msk [vmem:[#allocation2] sm:$0xff] %vm60_vm10, %v260_v20  ;;  %v400_v30 = vsel %vm246_vm0, 1.0, %v456_v0 }
 0x1bd   :  { %v295_v32 = vadd.f32 %v400_v30, %v291_v11  ;;  %v198_v34 = vadd.s32 %v197_v19, %v195_v23  ;;  %v174_v12 = vsel %vm166_vm14, %v170_v25, 0.0 }
 0x1be   :  { %v262_v33 = vadd.f32 %v258_v29, %v174_v12  ;;  %v209_v36 = vpop.xlane.xlu1 %208 }
 0x1bf   :  { %299 = vst.msk [vmem:[#allocation4 + $0x10] sm:$0xff] %vm60_vm10, %v295_v32  ;;  %vm244_vm3 = vcmp.eq.s32.totalorder %v198_v34, %v550_v28  ;;  %v210_v52 = vcvt.f32.s32 %v209_v36  ;;  %v241_v28 = vcvt.f32.s32 %v647_v24  ;;  %v305_v60 = vld [vmem:[#allocation2 + $0x8] sm:$0xff] }
 0x1c0   :  { %v398_v37 = vsel %vm244_vm3, 1.0, %v456_v0  ;;  %267 = vst.msk [vmem:[#allocation2 + $0x10] sm:$0xff] %vm60_vm10, %v262_v33 }
 0x1c1   :  { %v293_v40 = vadd.f32 %v398_v37, %v289_v35  ;;  %v213_v41 = vadd.s32 %v212_v39, %v210_v52  ;;  %v242_v46 = vshll.u32 %v241_v28, 16 }
 0x1c3   :  { %297 = vst.msk [vmem:[#allocation4] sm:$0xff] %vm60_vm10, %v293_v40  ;;  %vm245_vm4 = vcmp.eq.s32.totalorder %v213_v41, %v539_v26  ;;  %v304_v59 = vld [vmem:[#allocation2] sm:$0xff] }
 0x1c4   :  { %v399_v27 = vsel %vm245_vm4, 1.0, %v456_v0  ;;  %v308_v62 = vsel %vm60_vm10, %v304_v59, 0.0 }
 0x1c5   :  { %v294_v42 = vadd.f32 %v399_v27, %v290_v5 }
 0x1c6   :  { %v346_v8 = vld [vmem:[#allocation4 + $0x10] sm:$0xff] }
 0x1c7   :  { %298 = vst.msk [vmem:[#allocation4 + $0x8] sm:$0xff] %vm60_vm10, %v294_v42  ;;  %v306_v61 = vld [vmem:[#allocation2 + $0x10] sm:$0xff]  ;;  %v351_v14 = vsel %vm60_vm10, %v346_v8, 0.0 }
 0x1c8   :  { %v311_v3 = vsel %vm60_vm10, %v306_v61, 0.0 }
 0x1ca   :  { %v344_v63 = vld [vmem:[#allocation4] sm:$0xff] }
 0x1cb   :  { %v348_v4 = vsel %vm60_vm10, %v344_v63, 0.0 }
 0x1ce   :  { %v345_v31 = vld [vmem:[#allocation4 + $0x8] sm:$0xff] }
 0x1cf   :  { %v349_v2 = vsel %vm60_vm10, %v345_v31, 0.0 }
 0x1d0   :  { %v350_v9 = vadd.f32 %v349_v2, %v348_v4 }
 0x1d2   :  { %v352_v53 = vadd.f32 %v351_v14, %v350_v9 }
 0x1e6   :  { %v239_v45 = vpop.xlane.xlu1 %238 }
 0x1e7   :  { %v240_v47 = vcvt.f32.s32 %v239_v45 }
 0x1e9   :  { %v243_v48 = vadd.s32 %v242_v46, %v240_v47 }
 0x1eb   :  { %vm247_vm5 = vcmp.eq.s32.totalorder %v243_v48, %v572_v38  ;;  %v163_v26 = vpop.xlane.xlu1 %162 }
 0x1ec   :  { %v401_v54 = vsel %vm247_vm5, 1.0, %v456_v0  ;;  %v171_v55 = vsub.f32 %v129_v50, %v163_v26  ;;  %v309_v0 = vsel %vm60_vm10, %v305_v60, 0.0 }
 0x1ed   :  { %v296_v57 = vadd.f32 %v401_v54, %v292_v49  ;;  %v310_v38 = vadd.f32 %v309_v0, %v308_v62 }
 0x1ee   :  { %v175_v58 = vsel %vm167_vm2, %v171_v55, 0.0 }
 0x1ef   :  { %300 = vst.msk [vmem:[#allocation4 + $0x18] sm:$0xff] %vm60_vm10, %v296_v57  ;;  %v263_v24 = vadd.f32 %v259_v56, %v175_v58  ;;  %v312_v7 = vadd.f32 %v311_v3, %v310_v38 }
 0x1f0   :  { %v336_v18 = vpop.xlane.xlu1 %335 }
 0x1f1   :  { %268 = vst.msk [vmem:[#allocation2 + $0x18] sm:$0xff] %vm60_vm10, %v263_v24  ;;  %v337_v19 = vrot.slane %v336_v18, 4 }
 0x1f3   :  { %v338_v20 = vadd.f32 %v337_v19, %v336_v18 }
 0x1f5   :  { %v339_v11 = vrot.slane %v338_v20, 2 }
 0x1f6   :  { %v347_v1 = vld [vmem:[#allocation4 + $0x18] sm:$0xff] }
 0x1f7   :  { %v353_v15 = vsel %vm60_vm10, %v347_v1, 0.0  ;;  %v340_v23 = vadd.f32 %v339_v11, %v338_v20 }
 0x1f8   :  { %v307_v6 = vld [vmem:[#allocation2 + $0x18] sm:$0xff]  ;;  %v354_v17 = vadd.f32 %v353_v15, %v352_v53 }
 0x1f9   :  { %v313_v13 = vsel %vm60_vm10, %v307_v6, 0.0  ;;  %v341_v12 = vrot.slane %v340_v23, 1 }
 0x1fa   :  { %v314_v16 = vadd.f32 %v313_v13, %v312_v7 }
 0x1fb   :  { %v342_v52 = vadd.f32 %v341_v12, %v340_v23 }
 0x1fc   :  { %315 = vadd.xlane.f32.xlu0 %v314_v16 }
 0x200   :  { %355 = vadd.xlane.f32.xlu0 %v354_v17 }
 0x285   :  { %v316_v21 = vpop.xlane.xlu0 %315 }
 0x286   :  { %v317_v51 = vrot.slane %v316_v21, 4 }
 0x288   :  { %v318_v22 = vadd.f32 %v317_v51, %v316_v21 }
 0x289   :  { %v356_v25 = vpop.xlane.xlu0 %355 }
 0x28a   :  { %v319_v29 = vrot.slane %v318_v22, 2  ;;  %v357_v30 = vrot.slane %v356_v25, 4 }
 0x28c   :  { %v358_v32 = vadd.f32 %v357_v30, %v356_v25  ;;  %v320_v34 = vadd.f32 %v319_v29, %v318_v22 }
 0x28e   :  { %v359_v35 = vrot.slane %v358_v32, 2  ;;  %v321_v33 = vrot.slane %v320_v34, 1 }
 0x290   :  { %v360_v36 = vadd.f32 %v359_v35, %v358_v32  ;;  %v322_v39 = vadd.f32 %v321_v33, %v320_v34 }
 0x292   :  { %406 = vpush %v322_v39  ;;  %v361_v37 = vrot.slane %v360_v36, 1 }
 0x293   :  { %408 = vpush %v342_v52 }
 0x294   :  { %v362_v40 = vadd.f32 %v361_v37, %v360_v36 }
 0x296   :  { %410 = vpush %v362_v40 }
 0x2c3   :  { %s407_s1 = spop %406 }
 0x2c4   :  { %s409_s24 = spop %408  ;;  %v369_v27 = vstv %s407_s1 }
 0x2c5   :  { %v366_v41 = vstv %s409_s24 }
 0x2c7   :  { %s411_s27 = spop %410 }
 0x2c8   :  { %v367_v5 = vstv %s411_s27 }
 0x2c9   :  { %v368_v42 = vsel %vm365_vm6, %v366_v41, %v367_v5 }
 0x2ca   :  { %v370_v43 = vsel %vm364_vm7, %v369_v27, %v368_v42 }
 0x2cb   :  { %371 = vst [vmem:[#allocation5] sm:$0xff] %v370_v43 }
 0x2cc   :  { %444 = shalt.err (!%p441_p4)
}
 0x2cd   :  { %381 = dma.vmem_to_hbm [thread:$0]  %s379_s26, 128, %s710_s2, [#allocation6]  }
 0x2ce   :  { %453 = dma.done.wait [#allocation6], 128  }
 0x2cf   :  { %454 = vsyncadd [#allocation6], 4294967168 }
 0x2d0   :  { %385 = vsyncpa [#allocation6], 1 }

</bundles_post_ra>
